<compile_context>
chip_gen: v5e
topology: v5e:2x2
jax: 0.10.0
libtpu: 0.0.40
codegen_flags: <defaults>
</compile_context>

<pallas_src>
import functools

import jax
import jax.numpy as jnp
from jax.experimental import pallas as pl
from jax.experimental.pallas import tpu as pltpu

MAX_TILE_M = 16 * 1024          # hard cap on spatial lanes per feature block
MIN_TILE_M = 512


def _round_up(x, m):
    return (x + m - 1) // m * m


@functools.lru_cache(maxsize=None)
def _vmem_limit_bytes():
    """Generation-aware scoped-VMEM request (headroom left for compiler scratch)."""
    cap = 64 * 1024 * 1024                     # conservative fallback (v7x-sized)
    try:
        info = pltpu.get_tpu_info()
        cap = int(getattr(info, "vmem_capacity_bytes", cap)) or cap
    except Exception:
        pass
    # v5e/v6e (128 MiB) -> ~96 MiB ; v7x (64 MiB) -> 48 MiB.
    return int(max(min(cap * 3 // 4, 100 * 1024 * 1024), 32 * 1024 * 1024))


def _choose_tile_m(c, m, with_content, vmem_limit):
    """Cp-adaptive spatial tile. Returns (tile_m, padded_m)."""
    gram_bytes = 3 * c * c * 4                           # Gs in-blocks + scratch
    feat_budget = max(vmem_limit - gram_bytes - 8 * 1024 * 1024, 4 * 1024 * 1024)
    n_blocks = (2 if with_content else 1) * 2            # inputs x double-buffer
    tile = feat_budget // (c * 4 * n_blocks)              # f32 blocks in VMEM
    tile = max(min(tile, MAX_TILE_M), MIN_TILE_M)
    tile = (tile // 128) * 128
    if m <= tile:
        return m, m                                       # single tile, no pad
    t = tile
    while t >= 128 and m % t != 0:                        # prefer a divisor
        t -= 128
    if t >= 128:
        return t, m
    return tile, _round_up(m, tile)                       # rare: pad remainder


def _prepare_features(fm, with_content):
    """(N, c, h, w) f32 -> (N, c, Mp) f32 (no copy unless padding is forced)."""
    n, c, h, w = fm.shape
    m = h * w
    tile_m, mp = _choose_tile_m(c, m, with_content, _vmem_limit_bytes())
    x = fm.reshape(n, c, m)                               # free reshape, stays f32
    if mp != m:
        # zeros are benign: contribute 0 to the Gram and F/Fc padded identically
        x = jnp.pad(x, ((0, 0), (0, 0), (0, mp - m)))
    return x, tile_m


# ----------------------------------------------------------------------------
# Kernel 1: hoisted style-target Gram.   grid = (nsplit ["parallel"], M_tiles)
# Each split accumulates a partial (c, c) Gram of Fs tiles (bf16 in / f32 acc);
# the nsplit partials are summed by a tiny XLA op.  nsplit=2 keeps both v7x
# TensorCores busy for this kernel.
# ----------------------------------------------------------------------------
def _gram_kernel(fs_ref, gram_ref):
    @pl.when(pl.program_id(1) == 0)
    def _init():
        gram_ref[...] = jnp.zeros_like(gram_ref)

    fs = fs_ref[...].astype(jnp.bfloat16)                 # cast in-kernel
    gram_ref[...] += jax.lax.dot_general(
        fs, fs, (((1,), (1,)), ((), ())), preferred_element_type=jnp.float32)


def _style_gram(x3, tile_m):
    n, c, mp = x3.shape
    mt = mp // tile_m
    nsplit = 2 if (mt >= 2 and mt % 2 == 0) else 1
    mt_per = mt // nsplit

    parts = pl.pallas_call(
        _gram_kernel,
        grid=(nsplit, mt_per),
        in_specs=[pl.BlockSpec(
            (pl.Squeezed(), c, tile_m),
            lambda s, t, _mp=mt_per: (0, 0, s * _mp + t))],   # row 0 = style target
        out_specs=pl.BlockSpec((pl.Squeezed(), c, c), lambda s, t: (s, 0, 0)),
        out_shape=jax.ShapeDtypeStruct((nsplit, c, c), jnp.float32),
        compiler_params=pltpu.CompilerParams(
            dimension_semantics=("parallel", "arbitrary"),
            vmem_limit_bytes=_vmem_limit_bytes()),
        cost_estimate=pl.CostEstimate(
            flops=int(2 * c * c * mp),
            transcendentals=0,
            bytes_accessed=int(c * mp * 4 + nsplit * c * c * 4)),
    )(x3)
    return jnp.sum(parts, axis=0)                         # tiny (c,c) combine


# ----------------------------------------------------------------------------
# Kernel 2: fused per-triple loss.   grid = (num_triples ["parallel"], M_tiles)
# Per triple i: accumulate gram_f = F_i @ F_i.T over spatial tiles in a VMEM
# (c, c) f32 scratch; (j==2 only) accumulate the content sum-of-squares into
# an (8, tile_m) VPU-only partial accumulator; on the last tile emit
#   alpha/CHW^2 * sum((Gs - G)^2)  [+ beta/CHW * content]
# as one lane-dense (1, 128) row per triple.
# ----------------------------------------------------------------------------
def _loss_kernel(*refs, alpha_over_chw2, beta_over_chw, with_content):
    if with_content:
        gram_fs_ref, f_ref, fc_ref, out_ref, gram_acc, cont_acc = refs
    else:
        gram_fs_ref, f_ref, out_ref, gram_acc = refs
        fc_ref = cont_acc = None

    t = pl.program_id(1)
    nt = pl.num_programs(1)
    c = f_ref.shape[0]

    @pl.when(t == 0)
    def _init():
        gram_acc[...] = jnp.zeros_like(gram_acc)
        if with_content:
            cont_acc[...] = jnp.zeros_like(cont_acc)

    f32 = f_ref[...]                                      # (c, tile_m) f32
    fb = f32.astype(jnp.bfloat16)                         # bf16 in / f32 acc MXU
    gram_acc[...] += jax.lax.dot_general(
        fb, fb, (((1,), (1,)), ((), ())), preferred_element_type=jnp.float32)

    if with_content:
        d = f32 - fc_ref[...]                             # f32 content diff
        dd = d * d
        if c % 8 == 0:
            # Fold sublane row-groups with vreg-aligned static slices:
            # pure VPU adds, no cross-lane (XLU) reduce in the hot loop.
            part = dd[0:8, :]
            for s in range(8, c, 8):
                part = part + dd[s:s + 8, :]
        else:
            part = jnp.sum(dd, axis=0, keepdims=True)     # rare fallback
        cont_acc[...] += part

    @pl.when(t == nt - 1)
    def _finalize():
        gd = gram_fs_ref[...] - gram_acc[...]
        loss = alpha_over_chw2 * jnp.sum(gd * gd, keepdims=True)        # (1, 1)
        if with_content:
            loss = loss + beta_over_chw * jnp.sum(cont_acc[...], keepdims=True)
        out_ref[...] = jnp.broadcast_to(loss, (1, 128))


def _fused_loss(gram_fs, x3, batchsize, tile_m, *, alpha_over_chw2,
                beta_over_chw, with_content):
    n, c, mp = x3.shape
    mt = mp // tile_m
    b = batchsize

    kernel = functools.partial(
        _loss_kernel,
        alpha_over_chw2=alpha_over_chw2,
        beta_over_chw=beta_over_chw,
        with_content=with_content)

    in_specs = [
        pl.BlockSpec((c, c), lambda i, t: (0, 0)),                     # hoisted Gs
        pl.BlockSpec((pl.Squeezed(), c, tile_m),
                     lambda i, t: (1 + i, 0, t)),                      # F_i tile
    ]
    inputs = [gram_fs, x3]
    scratch = [pltpu.VMEM((c, c), jnp.float32)]
    if with_content:
        in_specs.append(pl.BlockSpec(
            (pl.Squeezed(), c, tile_m),
            lambda i, t, _b=b: (1 + _b + i, 0, t)))                    # Fc_i tile
        inputs.append(x3)
        scratch.append(pltpu.VMEM((8 if c % 8 == 0 else 1, tile_m), jnp.float32))

    feat_bytes = c * mp * 4 * (2 if with_content else 1)
    out = pl.pallas_call(
        kernel,
        grid=(b, mt),
        in_specs=in_specs,
        out_specs=pl.BlockSpec((pl.Squeezed(), 1, 128), lambda i, t: (i, 0, 0)),
        out_shape=jax.ShapeDtypeStruct((b, 1, 128), jnp.float32),
        scratch_shapes=scratch,
        compiler_params=pltpu.CompilerParams(
            dimension_semantics=("parallel", "arbitrary"),
            vmem_limit_bytes=_vmem_limit_bytes()),
        cost_estimate=pl.CostEstimate(
            flops=int(2 * c * c * mp * b),
            transcendentals=0,
            bytes_accessed=int(b * (feat_bytes + c * c * 4 + 128 * 4))),
    )(*inputs)
    return out[:, 0, 0]                                                # (B,)


# ----------------------------------------------------------------------------
# Loss_Net forward (Pallas-backed)
# ----------------------------------------------------------------------------
def loss_net_forward(x, feature_fn, alpha=9.0, beta=1.0):
    n = x.shape[0]
    batchsize = (n - 1) // 2

    # Feature extraction is a per-image op, so one batched pass over all N
    # images is equivalent to the per-triple extraction in the PyTorch module
    # (and avoids recomputing the style target's features per triple).
    feats = feature_fn(x)                      # list of (n, c, h, w) f32

    total = jnp.float32(0.0)
    for j, fm in enumerate(feats):
        _, c, h, w = fm.shape
        chw = float(c * h * w)
        with_content = (j == 2)

        x3, tile_m = _prepare_features(fm, with_content)   # (n, c, Mp) f32
        gram_fs = _style_gram(x3, tile_m)                   # hoisted, once per map

        per_triple = _fused_loss(
            gram_fs, x3, batchsize, tile_m,
            alpha_over_chw2=float(alpha) / (chw * chw),
            beta_over_chw=float(beta) / chw,
            with_content=with_content)
        total = total + jnp.sum(per_triple)
    return total / batchsize


# ----------------------------------------------------------------------------
# Synthetic deterministic stand-in for the external `vgg16net` argument.
# TODO(synk): the original passes a pretrained torchvision VGG16; here a
# deterministic random-init mini conv/relu/pool extractor (plain JAX) stands in.
# ----------------------------------------------------------------------------
def make_vgg_params(key):
    chans = [(3, 8), (8, 16), (16, 32)]
    params = []
    for (cin, cout) in chans:
        key, kw, kb = jax.random.split(key, 3)
        w = jax.random.normal(kw, (cout, cin, 3, 3), jnp.float32) * 0.1
        b = jax.random.normal(kb, (cout,), jnp.float32) * 0.01
        params.append((w, b))
    return params


def vgg_features(x, params):
    # x: (N, 3, H, W) NCHW
    feats = []
    h = x
    for (w, b) in params:
        h = jax.lax.conv_general_dilated(
            h, w, window_strides=(1, 1), padding="SAME",
            dimension_numbers=("NCHW", "OIHW", "NCHW"))
        h = jax.nn.relu(h + b[None, :, None, None])
        feats.append(h)
        h = jax.lax.reduce_window(
            h, -jnp.inf, jax.lax.max, (1, 1, 2, 2), (1, 1, 2, 2), "VALID")
    return feats


# ----------------------------------------------------------------------------
# Pure-JAX f32 reference (mirrors the PyTorch code exactly).
# ----------------------------------------------------------------------------
def loss_net_forward_ref(x, feature_fn, alpha=9.0, beta=1.0):
    n = x.shape[0]
    batchsize = (n - 1) // 2
    total = jnp.float32(0.0)
    for i in range(1, batchsize + 1):
        tempx = jnp.stack([x[0], x[i], x[i + batchsize]], axis=0)
        feats = feature_fn(tempx)
        loss = jnp.float32(0.0)
        for j, fm in enumerate(feats):
            k, c, h, w = fm.shape
            f3 = fm.reshape(k, c, h * w)
            fs, f, fc = f3[0], f3[1], f3[2]
            chw = float(c * h * w)
            gs = (fs @ fs.T) / chw
            g = (f @ f.T) / chw
            loss = loss + alpha * jnp.sum((gs - g) ** 2)
            if j == 2:
                loss = loss + beta * jnp.sum((f - fc) ** 2) / chw
        total = total + loss
    return total / batchsize


if __name__ == "__main__":
    key = jax.random.PRNGKey(0)
    k_x, k_p = jax.random.split(key)

    # x: 5 images => batchsize = 2 triples (x[0] is the shared style target)
    n, cin, H, W = 5, 3, 32, 32
    x = jax.random.normal(k_x, (n, cin, H, W), jnp.float32)

    params = make_vgg_params(k_p)
    feature_fn = functools.partial(vgg_features, params=params)

    fwd = jax.jit(lambda xx: loss_net_forward(xx, feature_fn, alpha=9.0, beta=1.0))
    out = jax.block_until_ready(fwd(x))

    ref_fwd = jax.jit(lambda xx: loss_net_forward_ref(xx, feature_fn, alpha=9.0, beta=1.0))
    ref = jax.block_until_ready(ref_fwd(x))

    assert out.shape == ()
    assert jnp.isfinite(out)
    assert jnp.allclose(out, ref, rtol=5e-2, atol=1e-3), (out, ref)
    print("KERNEL_OK")
</pallas_src>

<mosaic_0001>
module attributes {stable_mosaic.version = 11 : i64} {
  func.func @_gram_kernel(%arg0: i32, %arg1: i32, %arg2: memref<1x8x1024xf32, #tpu.memory_space<vmem>>, %arg3: memref<1x8x8xf32, #tpu.memory_space<vmem>>) attributes {dimension_semantics = [#tpu.dimension_semantics<parallel>, #tpu.dimension_semantics<arbitrary>], iteration_bounds = array<i64: 1, 1>, scalar_prefetch = 0 : i64, scratch_operands = 0 : i64, tpu.core_type = #tpu.core_type<tc>, window_params = [{transform_indices = @transform_0, window_bounds = array<i64: 1, 8, 1024>}, {transform_indices = @transform_1, window_bounds = array<i64: 1, 8, 8>}]} {
    %c0_i32 = arith.constant 0 : i32
    %0 = arith.cmpi eq, %arg1, %c0_i32 : i32
    %1 = arith.extui %0 : i1 to i32
    %c0_i32_0 = arith.constant 0 : i32
    %2 = arith.cmpi ne, %1, %c0_i32_0 : i32
    scf.if %2 {
      %cst_9 = arith.constant 0.000000e+00 : f32
      %13 = vector.broadcast %cst_9 : f32 to vector<8x8xf32>
      %c0_10 = arith.constant 0 : index
      %c0_11 = arith.constant 0 : index
      %c0_12 = arith.constant 0 : index
      %14 = vector.load %arg3[%c0_10, %c0_11, %c0_12] : memref<1x8x8xf32, #tpu.memory_space<vmem>>, vector<1x8x8xf32>
      %15 = vector.shape_cast %14 : vector<1x8x8xf32> to vector<8x8xf32>
      %16 = vector.shape_cast %13 : vector<8x8xf32> to vector<1x8x8xf32>
      tpu.vector_store %arg3[%c0_10, %c0_11, %c0_12], %16 {strides = array<i32>} : memref<1x8x8xf32, #tpu.memory_space<vmem>>, vector<1x8x8xf32>,
    } else {
    }
    %c0 = arith.constant 0 : index
    %c0_1 = arith.constant 0 : index
    %c0_2 = arith.constant 0 : index
    %3 = vector.load %arg2[%c0, %c0_1, %c0_2] : memref<1x8x1024xf32, #tpu.memory_space<vmem>>, vector<1x8x1024xf32>
    %4 = vector.shape_cast %3 : vector<1x8x1024xf32> to vector<8x1024xf32>
    %5 = arith.truncf %4 : vector<8x1024xf32> to vector<8x1024xbf16>
    %c0_3 = arith.constant 0 : index
    %c0_4 = arith.constant 0 : index
    %c0_5 = arith.constant 0 : index
    %6 = vector.load %arg3[%c0_3, %c0_4, %c0_5] : memref<1x8x8xf32, #tpu.memory_space<vmem>>, vector<1x8x8xf32>
    %7 = vector.shape_cast %6 : vector<1x8x8xf32> to vector<8x8xf32>
    %cst = arith.constant dense<0.000000e+00> : vector<8x8xf32>
    %8 = tpu.matmul %5, %5, %cst {dimension_numbers = #tpu.dot_dimension_numbers<[1], [1], [0], [0], [0, 0, 1, 0], [], []>} : vector<8x1024xbf16>, vector<8x1024xbf16>, vector<8x8xf32> -> vector<8x8xf32>
    %9 = arith.addf %7, %8 : vector<8x8xf32>
    %c0_6 = arith.constant 0 : index
    %c0_7 = arith.constant 0 : index
    %c0_8 = arith.constant 0 : index
    %10 = vector.load %arg3[%c0_6, %c0_7, %c0_8] : memref<1x8x8xf32, #tpu.memory_space<vmem>>, vector<1x8x8xf32>
    %11 = vector.shape_cast %10 : vector<1x8x8xf32> to vector<8x8xf32>
    %12 = vector.shape_cast %9 : vector<8x8xf32> to vector<1x8x8xf32>
    tpu.vector_store %arg3[%c0_6, %c0_7, %c0_8], %12 {strides = array<i32>} : memref<1x8x8xf32, #tpu.memory_space<vmem>>, vector<1x8x8xf32>,
    return
  }
  func.func @transform_0(%arg0: i32, %arg1: i32) -> (i32, i32, i32) {
    %c1_i32 = arith.constant 1 : i32
    %0 = arith.muli %arg0, %c1_i32 : i32
    %1 = arith.addi %0, %arg1 : i32
    %c0_i32 = arith.constant 0 : i32
    %c0_i32_0 = arith.constant 0 : i32
    %c0_i32_1 = arith.constant 0 : i32
    return %c0_i32, %c0_i32_0, %1 : i32, i32, i32
  }
  func.func @transform_1(%arg0: i32, %arg1: i32) -> (i32, i32, i32) {
    %c0_i32 = arith.constant 0 : i32
    %c0_i32_0 = arith.constant 0 : i32
    %c0_i32_1 = arith.constant 0 : i32
    return %arg0, %c0_i32, %c0_i32_0 : i32, i32, i32
  }
}

module attributes {stable_mosaic.version = 11 : i64} {
  func.func @_loss_kernel(%arg0: i32, %arg1: i32, %arg2: memref<8x8xf32, #tpu.memory_space<vmem>>, %arg3: memref<1x8x1024xf32, #tpu.memory_space<vmem>>, %arg4: memref<1x1x128xf32, #tpu.memory_space<vmem>>, %arg5: memref<8x8xf32, #tpu.memory_space<vmem>>) attributes {dimension_semantics = [#tpu.dimension_semantics<parallel>, #tpu.dimension_semantics<arbitrary>], iteration_bounds = array<i64: 2, 1>, scalar_prefetch = 0 : i64, scratch_operands = 1 : i64, tpu.core_type = #tpu.core_type<tc>, window_params = [{pipeline_mode = #tpu.pipeline_mode<synchronous>, transform_indices = @transform_0, window_bounds = array<i64: 8, 8>}, {transform_indices = @transform_1, window_bounds = array<i64: 1, 8, 1024>}, {transform_indices = @transform_2, window_bounds = array<i64: 1, 1, 128>}]} {
    %c0_i32 = arith.constant 0 : i32
    %0 = arith.cmpi eq, %arg1, %c0_i32 : i32
    %1 = arith.extui %0 : i1 to i32
    %c0_i32_0 = arith.constant 0 : i32
    %2 = arith.cmpi ne, %1, %c0_i32_0 : i32
    scf.if %2 {
      %cst_9 = arith.constant 0.000000e+00 : f32
      %13 = vector.broadcast %cst_9 : f32 to vector<8x8xf32>
      %c0_10 = arith.constant 0 : index
      %c0_11 = arith.constant 0 : index
      %14 = vector.load %arg5[%c0_10, %c0_11] : memref<8x8xf32, #tpu.memory_space<vmem>>, vector<8x8xf32>
      tpu.vector_store %arg5[%c0_10, %c0_11], %13 {strides = array<i32>} : memref<8x8xf32, #tpu.memory_space<vmem>>, vector<8x8xf32>,
    } else {
    }
    %c0 = arith.constant 0 : index
    %c0_1 = arith.constant 0 : index
    %c0_2 = arith.constant 0 : index
    %3 = vector.load %arg3[%c0, %c0_1, %c0_2] : memref<1x8x1024xf32, #tpu.memory_space<vmem>>, vector<1x8x1024xf32>
    %4 = vector.shape_cast %3 : vector<1x8x1024xf32> to vector<8x1024xf32>
    %5 = arith.truncf %4 : vector<8x1024xf32> to vector<8x1024xbf16>
    %c0_3 = arith.constant 0 : index
    %c0_4 = arith.constant 0 : index
    %6 = vector.load %arg5[%c0_3, %c0_4] : memref<8x8xf32, #tpu.memory_space<vmem>>, vector<8x8xf32>
    %cst = arith.constant dense<0.000000e+00> : vector<8x8xf32>
    %7 = tpu.matmul %5, %5, %cst {dimension_numbers = #tpu.dot_dimension_numbers<[1], [1], [0], [0], [0, 0, 1, 0], [], []>} : vector<8x1024xbf16>, vector<8x1024xbf16>, vector<8x8xf32> -> vector<8x8xf32>
    %8 = arith.addf %6, %7 : vector<8x8xf32>
    %c0_5 = arith.constant 0 : index
    %c0_6 = arith.constant 0 : index
    %9 = vector.load %arg5[%c0_5, %c0_6] : memref<8x8xf32, #tpu.memory_space<vmem>>, vector<8x8xf32>
    tpu.vector_store %arg5[%c0_5, %c0_6], %8 {strides = array<i32>} : memref<8x8xf32, #tpu.memory_space<vmem>>, vector<8x8xf32>,
    %c0_i32_7 = arith.constant 0 : i32
    %10 = arith.cmpi eq, %arg1, %c0_i32_7 : i32
    %11 = arith.extui %10 : i1 to i32
    %c0_i32_8 = arith.constant 0 : i32
    %12 = arith.cmpi ne, %11, %c0_i32_8 : i32
    scf.if %12 {
      %c0_9 = arith.constant 0 : index
      %c0_10 = arith.constant 0 : index
      %13 = vector.load %arg2[%c0_9, %c0_10] : memref<8x8xf32, #tpu.memory_space<vmem>>, vector<8x8xf32>
      %c0_11 = arith.constant 0 : index
      %c0_12 = arith.constant 0 : index
      %14 = vector.load %arg5[%c0_11, %c0_12] : memref<8x8xf32, #tpu.memory_space<vmem>>, vector<8x8xf32>
      %15 = arith.subf %13, %14 : vector<8x8xf32>
      %16 = arith.mulf %15, %15 : vector<8x8xf32>
      %17 = vector.shape_cast %16 : vector<8x8xf32> to vector<1x8x8xf32>
      %cst_13 = arith.constant dense<0.000000e+00> : vector<1xf32>
      %18 = vector.multi_reduction <add>, %17, %cst_13 [1, 2] : vector<1x8x8xf32> to vector<1xf32>
      %19 = vector.shape_cast %18 : vector<1xf32> to vector<1x1x1xf32>
      %20 = vector.extract %19[0, 0, 0] : f32 from vector<1x1x1xf32>
      %21 = vector.broadcast %20 : f32 to vector<1x1xf32>
      %cst_14 = arith.constant 1.34110451E-7 : f32
      %22 = vector.broadcast %cst_14 : f32 to vector<1x1xf32>
      %23 = arith.mulf %22, %21 : vector<1x1xf32>
      %24 = vector.shape_cast %23 : vector<1x1xf32> to vector<1x1xf32>
      %25 = vector.broadcast %24 : vector<1x1xf32> to vector<1x128xf32>
      %c0_15 = arith.constant 0 : index
      %c0_16 = arith.constant 0 : index
      %c0_17 = arith.constant 0 : index
      %26 = vector.load %arg4[%c0_15, %c0_16, %c0_17] : memref<1x1x128xf32, #tpu.memory_space<vmem>>, vector<1x1x128xf32>
      %27 = vector.shape_cast %26 : vector<1x1x128xf32> to vector<1x128xf32>
      %28 = vector.shape_cast %25 : vector<1x128xf32> to vector<1x1x128xf32>
      tpu.vector_store %arg4[%c0_15, %c0_16, %c0_17], %28 {strides = array<i32>} : memref<1x1x128xf32, #tpu.memory_space<vmem>>, vector<1x1x128xf32>,
    } else {
    }
    return
  }
  func.func @transform_0(%arg0: i32, %arg1: i32) -> (i32, i32) {
    %c0_i32 = arith.constant 0 : i32
    %c0_i32_0 = arith.constant 0 : i32
    %c0_i32_1 = arith.constant 0 : i32
    return %c0_i32, %c0_i32_0 : i32, i32
  }
  func.func @transform_1(%arg0: i32, %arg1: i32) -> (i32, i32, i32) {
    %c1_i32 = arith.constant 1 : i32
    %0 = arith.addi %c1_i32, %arg0 : i32
    %c0_i32 = arith.constant 0 : i32
    %c0_i32_0 = arith.constant 0 : i32
    return %0, %c0_i32, %arg1 : i32, i32, i32
  }
  func.func @transform_2(%arg0: i32, %arg1: i32) -> (i32, i32, i32) {
    %c0_i32 = arith.constant 0 : i32
    %c0_i32_0 = arith.constant 0 : i32
    %c0_i32_1 = arith.constant 0 : i32
    return %arg0, %c0_i32, %c0_i32_0 : i32, i32, i32
  }
}

module attributes {stable_mosaic.version = 11 : i64} {
  func.func @_gram_kernel(%arg0: i32, %arg1: i32, %arg2: memref<1x16x256xf32, #tpu.memory_space<vmem>>, %arg3: memref<1x16x16xf32, #tpu.memory_space<vmem>>) attributes {dimension_semantics = [#tpu.dimension_semantics<parallel>, #tpu.dimension_semantics<arbitrary>], iteration_bounds = array<i64: 1, 1>, scalar_prefetch = 0 : i64, scratch_operands = 0 : i64, tpu.core_type = #tpu.core_type<tc>, window_params = [{transform_indices = @transform_0, window_bounds = array<i64: 1, 16, 256>}, {transform_indices = @transform_1, window_bounds = array<i64: 1, 16, 16>}]} {
    %c0_i32 = arith.constant 0 : i32
    %0 = arith.cmpi eq, %arg1, %c0_i32 : i32
    %1 = arith.extui %0 : i1 to i32
    %c0_i32_0 = arith.constant 0 : i32
    %2 = arith.cmpi ne, %1, %c0_i32_0 : i32
    scf.if %2 {
      %cst_9 = arith.constant 0.000000e+00 : f32
      %13 = vector.broadcast %cst_9 : f32 to vector<16x16xf32>
      %c0_10 = arith.constant 0 : index
      %c0_11 = arith.constant 0 : index
      %c0_12 = arith.constant 0 : index
      %14 = vector.load %arg3[%c0_10, %c0_11, %c0_12] : memref<1x16x16xf32, #tpu.memory_space<vmem>>, vector<1x16x16xf32>
      %15 = vector.shape_cast %14 : vector<1x16x16xf32> to vector<16x16xf32>
      %16 = vector.shape_cast %13 : vector<16x16xf32> to vector<1x16x16xf32>
      tpu.vector_store %arg3[%c0_10, %c0_11, %c0_12], %16 {strides = array<i32>} : memref<1x16x16xf32, #tpu.memory_space<vmem>>, vector<1x16x16xf32>,
    } else {
    }
    %c0 = arith.constant 0 : index
    %c0_1 = arith.constant 0 : index
    %c0_2 = arith.constant 0 : index
    %3 = vector.load %arg2[%c0, %c0_1, %c0_2] : memref<1x16x256xf32, #tpu.memory_space<vmem>>, vector<1x16x256xf32>
    %4 = vector.shape_cast %3 : vector<1x16x256xf32> to vector<16x256xf32>
    %5 = arith.truncf %4 : vector<16x256xf32> to vector<16x256xbf16>
    %c0_3 = arith.constant 0 : index
    %c0_4 = arith.constant 0 : index
    %c0_5 = arith.constant 0 : index
    %6 = vector.load %arg3[%c0_3, %c0_4, %c0_5] : memref<1x16x16xf32, #tpu.memory_space<vmem>>, vector<1x16x16xf32>
    %7 = vector.shape_cast %6 : vector<1x16x16xf32> to vector<16x16xf32>
    %cst = arith.constant dense<0.000000e+00> : vector<16x16xf32>
    %8 = tpu.matmul %5, %5, %cst {dimension_numbers = #tpu.dot_dimension_numbers<[1], [1], [0], [0], [0, 0, 1, 0], [], []>} : vector<16x256xbf16>, vector<16x256xbf16>, vector<16x16xf32> -> vector<16x16xf32>
    %9 = arith.addf %7, %8 : vector<16x16xf32>
    %c0_6 = arith.constant 0 : index
    %c0_7 = arith.constant 0 : index
    %c0_8 = arith.constant 0 : index
    %10 = vector.load %arg3[%c0_6, %c0_7, %c0_8] : memref<1x16x16xf32, #tpu.memory_space<vmem>>, vector<1x16x16xf32>
    %11 = vector.shape_cast %10 : vector<1x16x16xf32> to vector<16x16xf32>
    %12 = vector.shape_cast %9 : vector<16x16xf32> to vector<1x16x16xf32>
    tpu.vector_store %arg3[%c0_6, %c0_7, %c0_8], %12 {strides = array<i32>} : memref<1x16x16xf32, #tpu.memory_space<vmem>>, vector<1x16x16xf32>,
    return
  }
  func.func @transform_0(%arg0: i32, %arg1: i32) -> (i32, i32, i32) {
    %c1_i32 = arith.constant 1 : i32
    %0 = arith.muli %arg0, %c1_i32 : i32
    %1 = arith.addi %0, %arg1 : i32
    %c0_i32 = arith.constant 0 : i32
    %c0_i32_0 = arith.constant 0 : i32
    %c0_i32_1 = arith.constant 0 : i32
    return %c0_i32, %c0_i32_0, %1 : i32, i32, i32
  }
  func.func @transform_1(%arg0: i32, %arg1: i32) -> (i32, i32, i32) {
    %c0_i32 = arith.constant 0 : i32
    %c0_i32_0 = arith.constant 0 : i32
    %c0_i32_1 = arith.constant 0 : i32
    return %arg0, %c0_i32, %c0_i32_0 : i32, i32, i32
  }
}

module attributes {stable_mosaic.version = 11 : i64} {
  func.func @_loss_kernel(%arg0: i32, %arg1: i32, %arg2: memref<16x16xf32, #tpu.memory_space<vmem>>, %arg3: memref<1x16x256xf32, #tpu.memory_space<vmem>>, %arg4: memref<1x1x128xf32, #tpu.memory_space<vmem>>, %arg5: memref<16x16xf32, #tpu.memory_space<vmem>>) attributes {dimension_semantics = [#tpu.dimension_semantics<parallel>, #tpu.dimension_semantics<arbitrary>], iteration_bounds = array<i64: 2, 1>, scalar_prefetch = 0 : i64, scratch_operands = 1 : i64, tpu.core_type = #tpu.core_type<tc>, window_params = [{pipeline_mode = #tpu.pipeline_mode<synchronous>, transform_indices = @transform_0, window_bounds = array<i64: 16, 16>}, {transform_indices = @transform_1, window_bounds = array<i64: 1, 16, 256>}, {transform_indices = @transform_2, window_bounds = array<i64: 1, 1, 128>}]} {
    %c0_i32 = arith.constant 0 : i32
    %0 = arith.cmpi eq, %arg1, %c0_i32 : i32
    %1 = arith.extui %0 : i1 to i32
    %c0_i32_0 = arith.constant 0 : i32
    %2 = arith.cmpi ne, %1, %c0_i32_0 : i32
    scf.if %2 {
      %cst_9 = arith.constant 0.000000e+00 : f32
      %13 = vector.broadcast %cst_9 : f32 to vector<16x16xf32>
      %c0_10 = arith.constant 0 : index
      %c0_11 = arith.constant 0 : index
      %14 = vector.load %arg5[%c0_10, %c0_11] : memref<16x16xf32, #tpu.memory_space<vmem>>, vector<16x16xf32>
      tpu.vector_store %arg5[%c0_10, %c0_11], %13 {strides = array<i32>} : memref<16x16xf32, #tpu.memory_space<vmem>>, vector<16x16xf32>,
    } else {
    }
    %c0 = arith.constant 0 : index
    %c0_1 = arith.constant 0 : index
    %c0_2 = arith.constant 0 : index
    %3 = vector.load %arg3[%c0, %c0_1, %c0_2] : memref<1x16x256xf32, #tpu.memory_space<vmem>>, vector<1x16x256xf32>
    %4 = vector.shape_cast %3 : vector<1x16x256xf32> to vector<16x256xf32>
    %5 = arith.truncf %4 : vector<16x256xf32> to vector<16x256xbf16>
    %c0_3 = arith.constant 0 : index
    %c0_4 = arith.constant 0 : index
    %6 = vector.load %arg5[%c0_3, %c0_4] : memref<16x16xf32, #tpu.memory_space<vmem>>, vector<16x16xf32>
    %cst = arith.constant dense<0.000000e+00> : vector<16x16xf32>
    %7 = tpu.matmul %5, %5, %cst {dimension_numbers = #tpu.dot_dimension_numbers<[1], [1], [0], [0], [0, 0, 1, 0], [], []>} : vector<16x256xbf16>, vector<16x256xbf16>, vector<16x16xf32> -> vector<16x16xf32>
    %8 = arith.addf %6, %7 : vector<16x16xf32>
    %c0_5 = arith.constant 0 : index
    %c0_6 = arith.constant 0 : index
    %9 = vector.load %arg5[%c0_5, %c0_6] : memref<16x16xf32, #tpu.memory_space<vmem>>, vector<16x16xf32>
    tpu.vector_store %arg5[%c0_5, %c0_6], %8 {strides = array<i32>} : memref<16x16xf32, #tpu.memory_space<vmem>>, vector<16x16xf32>,
    %c0_i32_7 = arith.constant 0 : i32
    %10 = arith.cmpi eq, %arg1, %c0_i32_7 : i32
    %11 = arith.extui %10 : i1 to i32
    %c0_i32_8 = arith.constant 0 : i32
    %12 = arith.cmpi ne, %11, %c0_i32_8 : i32
    scf.if %12 {
      %c0_9 = arith.constant 0 : index
      %c0_10 = arith.constant 0 : index
      %13 = vector.load %arg2[%c0_9, %c0_10] : memref<16x16xf32, #tpu.memory_space<vmem>>, vector<16x16xf32>
      %c0_11 = arith.constant 0 : index
      %c0_12 = arith.constant 0 : index
      %14 = vector.load %arg5[%c0_11, %c0_12] : memref<16x16xf32, #tpu.memory_space<vmem>>, vector<16x16xf32>
      %15 = arith.subf %13, %14 : vector<16x16xf32>
      %16 = arith.mulf %15, %15 : vector<16x16xf32>
      %17 = vector.shape_cast %16 : vector<16x16xf32> to vector<1x16x16xf32>
      %cst_13 = arith.constant dense<0.000000e+00> : vector<1xf32>
      %18 = vector.multi_reduction <add>, %17, %cst_13 [1, 2] : vector<1x16x16xf32> to vector<1xf32>
      %19 = vector.shape_cast %18 : vector<1xf32> to vector<1x1x1xf32>
      %20 = vector.extract %19[0, 0, 0] : f32 from vector<1x1x1xf32>
      %21 = vector.broadcast %20 : f32 to vector<1x1xf32>
      %cst_14 = arith.constant 5.36441803E-7 : f32
      %22 = vector.broadcast %cst_14 : f32 to vector<1x1xf32>
      %23 = arith.mulf %22, %21 : vector<1x1xf32>
      %24 = vector.shape_cast %23 : vector<1x1xf32> to vector<1x1xf32>
      %25 = vector.broadcast %24 : vector<1x1xf32> to vector<1x128xf32>
      %c0_15 = arith.constant 0 : index
      %c0_16 = arith.constant 0 : index
      %c0_17 = arith.constant 0 : index
      %26 = vector.load %arg4[%c0_15, %c0_16, %c0_17] : memref<1x1x128xf32, #tpu.memory_space<vmem>>, vector<1x1x128xf32>
      %27 = vector.shape_cast %26 : vector<1x1x128xf32> to vector<1x128xf32>
      %28 = vector.shape_cast %25 : vector<1x128xf32> to vector<1x1x128xf32>
      tpu.vector_store %arg4[%c0_15, %c0_16, %c0_17], %28 {strides = array<i32>} : memref<1x1x128xf32, #tpu.memory_space<vmem>>, vector<1x1x128xf32>,
    } else {
    }
    return
  }
  func.func @transform_0(%arg0: i32, %arg1: i32) -> (i32, i32) {
    %c0_i32 = arith.constant 0 : i32
    %c0_i32_0 = arith.constant 0 : i32
    %c0_i32_1 = arith.constant 0 : i32
    return %c0_i32, %c0_i32_0 : i32, i32
  }
  func.func @transform_1(%arg0: i32, %arg1: i32) -> (i32, i32, i32) {
    %c1_i32 = arith.constant 1 : i32
    %0 = arith.addi %c1_i32, %arg0 : i32
    %c0_i32 = arith.constant 0 : i32
    %c0_i32_0 = arith.constant 0 : i32
    return %0, %c0_i32, %arg1 : i32, i32, i32
  }
  func.func @transform_2(%arg0: i32, %arg1: i32) -> (i32, i32, i32) {
    %c0_i32 = arith.constant 0 : i32
    %c0_i32_0 = arith.constant 0 : i32
    %c0_i32_1 = arith.constant 0 : i32
    return %arg0, %c0_i32, %c0_i32_0 : i32, i32, i32
  }
}

module attributes {stable_mosaic.version = 11 : i64} {
  func.func @_gram_kernel(%arg0: i32, %arg1: i32, %arg2: memref<1x32x64xf32, #tpu.memory_space<vmem>>, %arg3: memref<1x32x32xf32, #tpu.memory_space<vmem>>) attributes {dimension_semantics = [#tpu.dimension_semantics<parallel>, #tpu.dimension_semantics<arbitrary>], iteration_bounds = array<i64: 1, 1>, scalar_prefetch = 0 : i64, scratch_operands = 0 : i64, tpu.core_type = #tpu.core_type<tc>, window_params = [{transform_indices = @transform_0, window_bounds = array<i64: 1, 32, 64>}, {transform_indices = @transform_1, window_bounds = array<i64: 1, 32, 32>}]} {
    %c0_i32 = arith.constant 0 : i32
    %0 = arith.cmpi eq, %arg1, %c0_i32 : i32
    %1 = arith.extui %0 : i1 to i32
    %c0_i32_0 = arith.constant 0 : i32
    %2 = arith.cmpi ne, %1, %c0_i32_0 : i32
    scf.if %2 {
      %cst_9 = arith.constant 0.000000e+00 : f32
      %13 = vector.broadcast %cst_9 : f32 to vector<32x32xf32>
      %c0_10 = arith.constant 0 : index
      %c0_11 = arith.constant 0 : index
      %c0_12 = arith.constant 0 : index
      %14 = vector.load %arg3[%c0_10, %c0_11, %c0_12] : memref<1x32x32xf32, #tpu.memory_space<vmem>>, vector<1x32x32xf32>
      %15 = vector.shape_cast %14 : vector<1x32x32xf32> to vector<32x32xf32>
      %16 = vector.shape_cast %13 : vector<32x32xf32> to vector<1x32x32xf32>
      tpu.vector_store %arg3[%c0_10, %c0_11, %c0_12], %16 {strides = array<i32>} : memref<1x32x32xf32, #tpu.memory_space<vmem>>, vector<1x32x32xf32>,
    } else {
    }
    %c0 = arith.constant 0 : index
    %c0_1 = arith.constant 0 : index
    %c0_2 = arith.constant 0 : index
    %3 = vector.load %arg2[%c0, %c0_1, %c0_2] : memref<1x32x64xf32, #tpu.memory_space<vmem>>, vector<1x32x64xf32>
    %4 = vector.shape_cast %3 : vector<1x32x64xf32> to vector<32x64xf32>
    %5 = arith.truncf %4 : vector<32x64xf32> to vector<32x64xbf16>
    %c0_3 = arith.constant 0 : index
    %c0_4 = arith.constant 0 : index
    %c0_5 = arith.constant 0 : index
    %6 = vector.load %arg3[%c0_3, %c0_4, %c0_5] : memref<1x32x32xf32, #tpu.memory_space<vmem>>, vector<1x32x32xf32>
    %7 = vector.shape_cast %6 : vector<1x32x32xf32> to vector<32x32xf32>
    %cst = arith.constant dense<0.000000e+00> : vector<32x32xf32>
    %8 = tpu.matmul %5, %5, %cst {dimension_numbers = #tpu.dot_dimension_numbers<[1], [1], [0], [0], [0, 0, 1, 0], [], []>} : vector<32x64xbf16>, vector<32x64xbf16>, vector<32x32xf32> -> vector<32x32xf32>
    %9 = arith.addf %7, %8 : vector<32x32xf32>
    %c0_6 = arith.constant 0 : index
    %c0_7 = arith.constant 0 : index
    %c0_8 = arith.constant 0 : index
    %10 = vector.load %arg3[%c0_6, %c0_7, %c0_8] : memref<1x32x32xf32, #tpu.memory_space<vmem>>, vector<1x32x32xf32>
    %11 = vector.shape_cast %10 : vector<1x32x32xf32> to vector<32x32xf32>
    %12 = vector.shape_cast %9 : vector<32x32xf32> to vector<1x32x32xf32>
    tpu.vector_store %arg3[%c0_6, %c0_7, %c0_8], %12 {strides = array<i32>} : memref<1x32x32xf32, #tpu.memory_space<vmem>>, vector<1x32x32xf32>,
    return
  }
  func.func @transform_0(%arg0: i32, %arg1: i32) -> (i32, i32, i32) {
    %c1_i32 = arith.constant 1 : i32
    %0 = arith.muli %arg0, %c1_i32 : i32
    %1 = arith.addi %0, %arg1 : i32
    %c0_i32 = arith.constant 0 : i32
    %c0_i32_0 = arith.constant 0 : i32
    %c0_i32_1 = arith.constant 0 : i32
    return %c0_i32, %c0_i32_0, %1 : i32, i32, i32
  }
  func.func @transform_1(%arg0: i32, %arg1: i32) -> (i32, i32, i32) {
    %c0_i32 = arith.constant 0 : i32
    %c0_i32_0 = arith.constant 0 : i32
    %c0_i32_1 = arith.constant 0 : i32
    return %arg0, %c0_i32, %c0_i32_0 : i32, i32, i32
  }
}

module attributes {stable_mosaic.version = 11 : i64} {
  func.func @_loss_kernel(%arg0: i32, %arg1: i32, %arg2: memref<32x32xf32, #tpu.memory_space<vmem>>, %arg3: memref<1x32x64xf32, #tpu.memory_space<vmem>>, %arg4: memref<1x32x64xf32, #tpu.memory_space<vmem>>, %arg5: memref<1x1x128xf32, #tpu.memory_space<vmem>>, %arg6: memref<32x32xf32, #tpu.memory_space<vmem>>, %arg7: memref<8x64xf32, #tpu.memory_space<vmem>>) attributes {dimension_semantics = [#tpu.dimension_semantics<parallel>, #tpu.dimension_semantics<arbitrary>], iteration_bounds = array<i64: 2, 1>, scalar_prefetch = 0 : i64, scratch_operands = 2 : i64, tpu.core_type = #tpu.core_type<tc>, window_params = [{pipeline_mode = #tpu.pipeline_mode<synchronous>, transform_indices = @transform_0, window_bounds = array<i64: 32, 32>}, {transform_indices = @transform_1, window_bounds = array<i64: 1, 32, 64>}, {transform_indices = @transform_2, window_bounds = array<i64: 1, 32, 64>}, {transform_indices = @transform_3, window_bounds = array<i64: 1, 1, 128>}]} {
    %c0_i32 = arith.constant 0 : i32
    %0 = arith.cmpi eq, %arg1, %c0_i32 : i32
    %1 = arith.extui %0 : i1 to i32
    %c0_i32_0 = arith.constant 0 : i32
    %2 = arith.cmpi ne, %1, %c0_i32_0 : i32
    scf.if %2 {
      %cst_16 = arith.constant 0.000000e+00 : f32
      %27 = vector.broadcast %cst_16 : f32 to vector<32x32xf32>
      %c0_17 = arith.constant 0 : index
      %c0_18 = arith.constant 0 : index
      %28 = vector.load %arg6[%c0_17, %c0_18] : memref<32x32xf32, #tpu.memory_space<vmem>>, vector<32x32xf32>
      tpu.vector_store %arg6[%c0_17, %c0_18], %27 {strides = array<i32>} : memref<32x32xf32, #tpu.memory_space<vmem>>, vector<32x32xf32>,
      %cst_19 = arith.constant 0.000000e+00 : f32
      %29 = vector.broadcast %cst_19 : f32 to vector<8x64xf32>
      %c0_20 = arith.constant 0 : index
      %c0_21 = arith.constant 0 : index
      %30 = vector.load %arg7[%c0_20, %c0_21] : memref<8x64xf32, #tpu.memory_space<vmem>>, vector<8x64xf32>
      tpu.vector_store %arg7[%c0_20, %c0_21], %29 {strides = array<i32>} : memref<8x64xf32, #tpu.memory_space<vmem>>, vector<8x64xf32>,
    } else {
    }
    %c0 = arith.constant 0 : index
    %c0_1 = arith.constant 0 : index
    %c0_2 = arith.constant 0 : index
    %3 = vector.load %arg3[%c0, %c0_1, %c0_2] : memref<1x32x64xf32, #tpu.memory_space<vmem>>, vector<1x32x64xf32>
    %4 = vector.shape_cast %3 : vector<1x32x64xf32> to vector<32x64xf32>
    %5 = arith.truncf %4 : vector<32x64xf32> to vector<32x64xbf16>
    %c0_3 = arith.constant 0 : index
    %c0_4 = arith.constant 0 : index
    %6 = vector.load %arg6[%c0_3, %c0_4] : memref<32x32xf32, #tpu.memory_space<vmem>>, vector<32x32xf32>
    %cst = arith.constant dense<0.000000e+00> : vector<32x32xf32>
    %7 = tpu.matmul %5, %5, %cst {dimension_numbers = #tpu.dot_dimension_numbers<[1], [1], [0], [0], [0, 0, 1, 0], [], []>} : vector<32x64xbf16>, vector<32x64xbf16>, vector<32x32xf32> -> vector<32x32xf32>
    %8 = arith.addf %6, %7 : vector<32x32xf32>
    %c0_5 = arith.constant 0 : index
    %c0_6 = arith.constant 0 : index
    %9 = vector.load %arg6[%c0_5, %c0_6] : memref<32x32xf32, #tpu.memory_space<vmem>>, vector<32x32xf32>
    tpu.vector_store %arg6[%c0_5, %c0_6], %8 {strides = array<i32>} : memref<32x32xf32, #tpu.memory_space<vmem>>, vector<32x32xf32>,
    %c0_7 = arith.constant 0 : index
    %c0_8 = arith.constant 0 : index
    %c0_9 = arith.constant 0 : index
    %10 = vector.load %arg4[%c0_7, %c0_8, %c0_9] : memref<1x32x64xf32, #tpu.memory_space<vmem>>, vector<1x32x64xf32>
    %11 = vector.shape_cast %10 : vector<1x32x64xf32> to vector<32x64xf32>
    %12 = arith.subf %4, %11 : vector<32x64xf32>
    %13 = arith.mulf %12, %12 : vector<32x64xf32>
    %14 = vector.extract_strided_slice %13 {offsets = [0, 0], sizes = [8, 64], strides = [1, 1]} : vector<32x64xf32> to vector<8x64xf32>
    %15 = vector.extract_strided_slice %13 {offsets = [8, 0], sizes = [8, 64], strides = [1, 1]} : vector<32x64xf32> to vector<8x64xf32>
    %16 = arith.addf %14, %15 : vector<8x64xf32>
    %17 = vector.extract_strided_slice %13 {offsets = [16, 0], sizes = [8, 64], strides = [1, 1]} : vector<32x64xf32> to vector<8x64xf32>
    %18 = arith.addf %16, %17 : vector<8x64xf32>
    %19 = vector.extract_strided_slice %13 {offsets = [24, 0], sizes = [8, 64], strides = [1, 1]} : vector<32x64xf32> to vector<8x64xf32>
    %20 = arith.addf %18, %19 : vector<8x64xf32>
    %c0_10 = arith.constant 0 : index
    %c0_11 = arith.constant 0 : index
    %21 = vector.load %arg7[%c0_10, %c0_11] : memref<8x64xf32, #tpu.memory_space<vmem>>, vector<8x64xf32>
    %22 = arith.addf %21, %20 : vector<8x64xf32>
    %c0_12 = arith.constant 0 : index
    %c0_13 = arith.constant 0 : index
    %23 = vector.load %arg7[%c0_12, %c0_13] : memref<8x64xf32, #tpu.memory_space<vmem>>, vector<8x64xf32>
    tpu.vector_store %arg7[%c0_12, %c0_13], %22 {strides = array<i32>} : memref<8x64xf32, #tpu.memory_space<vmem>>, vector<8x64xf32>,
    %c0_i32_14 = arith.constant 0 : i32
    %24 = arith.cmpi eq, %arg1, %c0_i32_14 : i32
    %25 = arith.extui %24 : i1 to i32
    %c0_i32_15 = arith.constant 0 : i32
    %26 = arith.cmpi ne, %25, %c0_i32_15 : i32
    scf.if %26 {
      %c0_16 = arith.constant 0 : index
      %c0_17 = arith.constant 0 : index
      %27 = vector.load %arg2[%c0_16, %c0_17] : memref<32x32xf32, #tpu.memory_space<vmem>>, vector<32x32xf32>
      %c0_18 = arith.constant 0 : index
      %c0_19 = arith.constant 0 : index
      %28 = vector.load %arg6[%c0_18, %c0_19] : memref<32x32xf32, #tpu.memory_space<vmem>>, vector<32x32xf32>
      %29 = arith.subf %27, %28 : vector<32x32xf32>
      %30 = arith.mulf %29, %29 : vector<32x32xf32>
      %31 = vector.shape_cast %30 : vector<32x32xf32> to vector<1x32x32xf32>
      %cst_20 = arith.constant dense<0.000000e+00> : vector<1xf32>
      %32 = vector.multi_reduction <add>, %31, %cst_20 [1, 2] : vector<1x32x32xf32> to vector<1xf32>
      %33 = vector.shape_cast %32 : vector<1xf32> to vector<1x1x1xf32>
      %34 = vector.extract %33[0, 0, 0] : f32 from vector<1x1x1xf32>
      %35 = vector.broadcast %34 : f32 to vector<1x1xf32>
      %cst_21 = arith.constant 2.14576721E-6 : f32
      %36 = vector.broadcast %cst_21 : f32 to vector<1x1xf32>
      %37 = arith.mulf %36, %35 : vector<1x1xf32>
      %c0_22 = arith.constant 0 : index
      %c0_23 = arith.constant 0 : index
      %38 = vector.load %arg7[%c0_22, %c0_23] : memref<8x64xf32, #tpu.memory_space<vmem>>, vector<8x64xf32>
      %39 = vector.shape_cast %38 : vector<8x64xf32> to vector<1x8x64xf32>
      %cst_24 = arith.constant dense<0.000000e+00> : vector<1xf32>
      %40 = vector.multi_reduction <add>, %39, %cst_24 [1, 2] : vector<1x8x64xf32> to vector<1xf32>
      %41 = vector.shape_cast %40 : vector<1xf32> to vector<1x1x1xf32>
      %42 = vector.extract %41[0, 0, 0] : f32 from vector<1x1x1xf32>
      %43 = vector.broadcast %42 : f32 to vector<1x1xf32>
      %cst_25 = arith.constant 4.8828125E-4 : f32
      %44 = vector.broadcast %cst_25 : f32 to vector<1x1xf32>
      %45 = arith.mulf %44, %43 : vector<1x1xf32>
      %46 = arith.addf %37, %45 : vector<1x1xf32>
      %47 = vector.shape_cast %46 : vector<1x1xf32> to vector<1x1xf32>
      %48 = vector.broadcast %47 : vector<1x1xf32> to vector<1x128xf32>
      %c0_26 = arith.constant 0 : index
      %c0_27 = arith.constant 0 : index
      %c0_28 = arith.constant 0 : index
      %49 = vector.load %arg5[%c0_26, %c0_27, %c0_28] : memref<1x1x128xf32, #tpu.memory_space<vmem>>, vector<1x1x128xf32>
      %50 = vector.shape_cast %49 : vector<1x1x128xf32> to vector<1x128xf32>
      %51 = vector.shape_cast %48 : vector<1x128xf32> to vector<1x1x128xf32>
      tpu.vector_store %arg5[%c0_26, %c0_27, %c0_28], %51 {strides = array<i32>} : memref<1x1x128xf32, #tpu.memory_space<vmem>>, vector<1x1x128xf32>,
    } else {
    }
    return
  }
  func.func @transform_0(%arg0: i32, %arg1: i32) -> (i32, i32) {
    %c0_i32 = arith.constant 0 : i32
    %c0_i32_0 = arith.constant 0 : i32
    %c0_i32_1 = arith.constant 0 : i32
    return %c0_i32, %c0_i32_0 : i32, i32
  }
  func.func @transform_1(%arg0: i32, %arg1: i32) -> (i32, i32, i32) {
    %c1_i32 = arith.constant 1 : i32
    %0 = arith.addi %c1_i32, %arg0 : i32
    %c0_i32 = arith.constant 0 : i32
    %c0_i32_0 = arith.constant 0 : i32
    return %0, %c0_i32, %arg1 : i32, i32, i32
  }
  func.func @transform_2(%arg0: i32, %arg1: i32) -> (i32, i32, i32) {
    %c3_i32 = arith.constant 3 : i32
    %0 = arith.addi %c3_i32, %arg0 : i32
    %c0_i32 = arith.constant 0 : i32
    %c0_i32_0 = arith.constant 0 : i32
    return %0, %c0_i32, %arg1 : i32, i32, i32
  }
  func.func @transform_3(%arg0: i32, %arg1: i32) -> (i32, i32, i32) {
    %c0_i32 = arith.constant 0 : i32
    %c0_i32_0 = arith.constant 0 : i32
    %c0_i32_1 = arith.constant 0 : i32
    return %arg0, %c0_i32, %c0_i32_0 : i32, i32, i32
  }
}

</mosaic_0001>

<bundles_post_ra>
// kernel: _lambda_.6
= control target key start
LH: loop header
LB: loop body
LE: loop exit
PB: predicated region body
PF: predicated region fallthrough
CT: control target
= control target key end

     0   :  { %vm35_vm0 = vcmask 64512   ;;  %v172_v16 = vmov 0.0   ;;  %s218_s0 = inlined_call_operand.vmem [shape: f32[5,8,1024], index: 0, kind: input, shape index: {}]   ;;  %s219_s1 = inlined_call_operand.vmem [shape: f32[1,8,8], index: 1, kind: output, shape index: {}]  }
   0x1   :  { %v37_v0 = vld [vmem:[%s218_s0] sm:$0xff]  ;;  %v38_v1 = vld [vmem:[%s218_s0 + $0x8] sm:$0xff]  ;;  %v39_v2 = vld [vmem:[%s218_s0 + $0x10] sm:$0xff]  ;;  %36 = vst.msk [vmem:[%s219_s1] sm:$0xff] %vm35_vm0, %v172_v16 }
   0x2   :  { %v45_v3 = vpack.c.bf16 %v37_v0, %v37_v0  ;;  %v46_v4 = vpack.c.bf16 %v38_v1, %v38_v1  ;;  %v47_v5 = vpack.c.bf16 %v39_v2, %v39_v2  ;;  %v40_v6 = vld [vmem:[%s218_s0 + $0x18] sm:$0xff]  ;;  %v43_v7 = vld [vmem:[%s218_s0 + $0x30] sm:$0xff]  ;;  %v41_v12 = vld [vmem:[%s218_s0 + $0x20] sm:$0xff] }
   0x3   :  { %v44_v8 = vld [vmem:[%s218_s0 + $0x38] sm:$0xff]  ;;  %v48_v9 = vpack.c.bf16 %v40_v6, %v40_v6  ;;  %v51_v10 = vpack.c.bf16 %v43_v7, %v43_v7  ;;  %v42_v13 = vld [vmem:[%s218_s0 + $0x28] sm:$0xff]  ;;  %v49_v14 = vpack.c.bf16 %v41_v12, %v41_v12 }
   0x4   :  { %v52_v11 = vpack.c.bf16 %v44_v8, %v44_v8  ;;  %61 = vmatpush.bf16.xpose.msra.mxu0 %v45_v3  ;;  %74 = vmatpush.bf16.xpose.msra.mxu1 %v46_v4  ;;  %v50_v15 = vpack.c.bf16 %v42_v13, %v42_v13 }
   0x5   :  { %87 = vmatpush.bf16.xpose.msra.mxu2 %v47_v5  ;;  %100 = vmatpush.bf16.xpose.msra.mxu3 %v48_v9 }
   0x8   :  { %v53_v37 = vld [vmem:[%s219_s1] sm:$0xff] }
   0xb   :  { %62 = vmatmul.bf16.vlgmr.msra.gmra.mxu0 %v45_v3  ;;  %75 = vmatmul.bf16.vlgmr.msra.gmra.mxu1 %v46_v4 }
   0xc   :  { %113 = vmatpush.bf16.xpose.msrb.mxu0 %v49_v14  ;;  %126 = vmatpush.bf16.xpose.msrb.mxu1 %v50_v15 }
   0xd   :  { %139 = vmatpush.bf16.xpose.msrb.mxu2 %v51_v10  ;;  %152 = vmatpush.bf16.xpose.msrb.mxu3 %v52_v11 }
   0xe   :  { %88 = vmatmul.bf16.vlgmr.msra.gmra.mxu2 %v47_v5  ;;  %101 = vmatmul.bf16.vlgmr.msra.gmra.mxu3 %v48_v9 }
  0x1b   :  { %114 = vmatmul.bf16.vlgmr.msrb.gmra.mxu0 %v49_v14  ;;  %127 = vmatmul.bf16.vlgmr.msrb.gmra.mxu1 %v50_v15 }
  0x1e   :  { %140 = vmatmul.bf16.vlgmr.msrb.gmra.mxu2 %v51_v10  ;;  %153 = vmatmul.bf16.vlgmr.msrb.gmra.mxu3 %v52_v11 }
  0x88   :  { %v63_v17 = vpop.f32.mrf.mxu0  ;;  %v76_v18 = vpop.f32.mrf.mxu1 }
  0x89   :  { %v77_v21 = vadd.f32 %v76_v18, %v63_v17 }
  0x90   :  { %v65_v22 = vpop.f32.mrf.mxu0  ;;  %v78_v23 = vpop.f32.mrf.mxu1 }
  0x91   :  { %v89_v19 = vpop.f32.mrf.mxu2  ;;  %v102_v20 = vpop.f32.mrf.mxu3 }
  0x92   :  { %v90_v24 = vadd.f32 %v89_v19, %v77_v21 }
  0x94   :  { %v103_v27 = vadd.f32 %v102_v20, %v90_v24 }
  0x98   :  { %v115_v28 = vpop.f32.mrf.mxu0  ;;  %v128_v29 = vpop.f32.mrf.mxu1 }
  0x99   :  { %v91_v25 = vpop.f32.mrf.mxu2  ;;  %v104_v26 = vpop.f32.mrf.mxu3  ;;  %v116_v30 = vadd.f32 %v115_v28, %v103_v27 }
  0x9b   :  { %v129_v31 = vadd.f32 %v128_v29, %v116_v30 }
  0xa0   :  { %v117_v35 = vpop.f32.mrf.mxu0  ;;  %v130_v36 = vpop.f32.mrf.mxu1 }
  0xa1   :  { %v141_v32 = vpop.f32.mrf.mxu2  ;;  %v154_v33 = vpop.f32.mrf.mxu3 }
  0xa2   :  { %v142_v34 = vadd.f32 %v141_v32, %v129_v31 }
  0xa4   :  { %v155_v38 = vadd.f32 %v154_v33, %v142_v34 }
  0xa6   :  { %v158_v39 = vadd.f32 %v155_v38, %v53_v37 }
  0xa8   :  { %160 = vst.msk [vmem:[%s219_s1] sm:$0xff] %vm35_vm0, %v158_v39 }
  0xa9   :  { %v143_v40 = vpop.f32.mrf.mxu2  ;;  %v156_v41 = vpop.f32.mrf.mxu3 }

// kernel: _lambda_.7
= control target key start
LH: loop header
LB: loop body
LE: loop exit
PB: predicated region body
PF: predicated region fallthrough
CT: control target
= control target key end

     0   :  { %s464_s9 = smov 0   ;;  %s466_s10 = smov 0   ;;  %s508_s0 = inlined_call_operand.vmem [shape: f32[8,8], index: 0, kind: input, shape index: {}]   ;;  %s509_s1 = inlined_call_operand.vmem [shape: f32[5,8,1024], index: 1, kind: input, shape index: {}]   ;;  %s510_s2 = inlined_call_operand.vmem [shape: f32[2,1,128], index: 2, kind: output, shape index: {}]  }
   0x1   :  { %s468_s11 = smov 0  }
   0x2 LB: > { %s24_s12 = sadd.s32 1, %s442_s10  ;;  %p391_p0 = scmp.ge.s32.totalorder %s446_s11, 1  ;;  %s446_s11 = sphi %s468_s11, %s12_s11   ;;  %s442_s10 = sphi %s466_s10, %s512_s10   ;;  %s438_s9 = sphi %s464_s9, %s511_s9  }
   0x3   : > { %p26_p1 = scmp.ge.s32.totalorder %s24_s12, 2  ;;  %p135_p2 = scmp.lt.s32.totalorder %s446_s11, 3 }
   0x5   : > { %s514_s12 = smov (%p26_p1, %s24_s12), 0  ;;  %p136_p3 = pnand %p391_p0, %p135_p2 }
   0x6   : > { %s160_s13 = sadd.s32 (!%p136_p3), 1, %s438_s9  ;;  %p172_p5 = scmp.lt.s32.totalorder (!%p136_p3), %s438_s9, 1 }
   0x7   : > { %139 = sbr.rel (%p136_p3) target bundleno = 377 (0x179), region = 28  ;;  %p162_p4 = scmp.lt.s32.totalorder (!%p136_p3), %s160_s13, 4 }
   0xc   : > { %s516_s13 = smov (!%p162_p4, %s160_s13), 4  ;;  %vm180_vm0 = vcmask 64512   ;;  %v448_v16 = vmov 0.0   ;;  %v309_v42 = vld [vmem:[%s508_s0] sm:$0xff]  ;;  %s518_s9 = smov (!%p172_p5, %s438_s9), 1 }
   0xd   : > { %s396_s14 = sshll.u32 %s516_s13, 6  ;;  %181 = vst.msk [vmem:[#allocation2] sm:$0xff] %vm180_vm0, %v448_v16  ;;  %s174_s23 = scalar_lea.vmem %s510_s2, %s518_s9 }
   0xe   : > { %s169_s17 = scalar_lea.vmem %s509_s1, %s396_s14 }
   0xf   : > { %v182_v0 = vld [vmem:[%s169_s17] sm:$0xff]  ;;  %v183_v1 = vld [vmem:[%s169_s17 + $0x8] sm:$0xff]  ;;  %v184_v2 = vld [vmem:[%s169_s17 + $0x10] sm:$0xff] }
  0x10   : > { %v190_v3 = vpack.c.bf16 %v182_v0, %v182_v0  ;;  %v191_v4 = vpack.c.bf16 %v183_v1, %v183_v1  ;;  %v192_v5 = vpack.c.bf16 %v184_v2, %v184_v2  ;;  %v185_v6 = vld [vmem:[%s169_s17 + $0x18] sm:$0xff]  ;;  %v188_v7 = vld [vmem:[%s169_s17 + $0x30] sm:$0xff]  ;;  %v186_v8 = vld [vmem:[%s169_s17 + $0x20] sm:$0xff] }
  0x11   : > { %v193_v9 = vpack.c.bf16 %v185_v6, %v185_v6  ;;  %v196_v10 = vpack.c.bf16 %v188_v7, %v188_v7  ;;  %v194_v11 = vpack.c.bf16 %v186_v8, %v186_v8  ;;  %v189_v12 = vld [vmem:[%s169_s17 + $0x38] sm:$0xff]  ;;  %v187_v13 = vld [vmem:[%s169_s17 + $0x28] sm:$0xff] }
  0x12   : > { %206 = vmatpush.bf16.xpose.msra.mxu0 %v190_v3  ;;  %219 = vmatpush.bf16.xpose.msra.mxu1 %v191_v4  ;;  %v197_v14 = vpack.c.bf16 %v189_v12, %v189_v12  ;;  %v195_v15 = vpack.c.bf16 %v187_v13, %v187_v13 }
  0x13   : > { %232 = vmatpush.bf16.xpose.msra.mxu2 %v192_v5  ;;  %245 = vmatpush.bf16.xpose.msra.mxu3 %v193_v9 }
  0x14   : > { %v198_v37 = vld [vmem:[#allocation2] sm:$0xff] }
  0x19   : > { %207 = vmatmul.bf16.vlgmr.msra.gmra.mxu0 %v190_v3  ;;  %220 = vmatmul.bf16.vlgmr.msra.gmra.mxu1 %v191_v4 }
  0x1a   : > { %258 = vmatpush.bf16.xpose.msrb.mxu0 %v194_v11  ;;  %271 = vmatpush.bf16.xpose.msrb.mxu1 %v195_v15 }
  0x1b   : > { %284 = vmatpush.bf16.xpose.msrb.mxu2 %v196_v10  ;;  %297 = vmatpush.bf16.xpose.msrb.mxu3 %v197_v14 }
  0x1c   : > { %233 = vmatmul.bf16.vlgmr.msra.gmra.mxu2 %v192_v5  ;;  %246 = vmatmul.bf16.vlgmr.msra.gmra.mxu3 %v193_v9 }
  0x29   : > { %259 = vmatmul.bf16.vlgmr.msrb.gmra.mxu0 %v194_v11  ;;  %272 = vmatmul.bf16.vlgmr.msrb.gmra.mxu1 %v195_v15 }
  0x2c   : > { %285 = vmatmul.bf16.vlgmr.msrb.gmra.mxu2 %v196_v10  ;;  %298 = vmatmul.bf16.vlgmr.msrb.gmra.mxu3 %v197_v14 }
  0x96   : > { %v208_v17 = vpop.f32.mrf.mxu0  ;;  %v221_v18 = vpop.f32.mrf.mxu1 }
  0x97   : > { %v222_v23 = vadd.f32 %v221_v18, %v208_v17 }
  0x9e   : > { %v210_v21 = vpop.f32.mrf.mxu0  ;;  %v223_v22 = vpop.f32.mrf.mxu1 }
  0x9f   : > { %v234_v19 = vpop.f32.mrf.mxu2  ;;  %v247_v20 = vpop.f32.mrf.mxu3 }
  0xa0   : > { %v235_v24 = vadd.f32 %v234_v19, %v222_v23 }
  0xa2   : > { %v248_v27 = vadd.f32 %v247_v20, %v235_v24 }
  0xa6   : > { %v260_v28 = vpop.f32.mrf.mxu0  ;;  %v273_v29 = vpop.f32.mrf.mxu1 }
  0xa7   : > { %v236_v25 = vpop.f32.mrf.mxu2  ;;  %v249_v26 = vpop.f32.mrf.mxu3  ;;  %v261_v30 = vadd.f32 %v260_v28, %v248_v27 }
  0xa9   : > { %v274_v31 = vadd.f32 %v273_v29, %v261_v30 }
  0xae   : > { %v262_v35 = vpop.f32.mrf.mxu0  ;;  %v275_v36 = vpop.f32.mrf.mxu1 }
  0xaf   : > { %v286_v32 = vpop.f32.mrf.mxu2  ;;  %v299_v33 = vpop.f32.mrf.mxu3 }
  0xb0   : > { %v287_v34 = vadd.f32 %v286_v32, %v274_v31 }
  0xb2   : > { %v300_v38 = vadd.f32 %v299_v33, %v287_v34 }
  0xb4   : > { %v303_v39 = vadd.f32 %v300_v38, %v198_v37 }
  0xb6   : > { %305 = vst.msk [vmem:[#allocation2] sm:$0xff] %vm180_vm0, %v303_v39 }
  0xb7   : > { %v288_v40 = vpop.f32.mrf.mxu2  ;;  %v301_v41 = vpop.f32.mrf.mxu3 }
  0xbd   : > { %v310_v43 = vld [vmem:[#allocation2] sm:$0xff] }
  0xbe   : > { %v311_v44 = vsub.f32 %v309_v42, %v310_v43 }
  0xc0   : > { %v312_v45 = vmul.f32 %v311_v44, %v311_v44 }
  0xc2   : > { %v313_v46 = vsel %vm180_vm0, %v312_v45, 0.0 }
  0xc3   : > { %314 = vadd.xlane.f32.xlu0 %v313_v46 }
 0x136   : > { %v315_v47 = vpop.xlane.xlu0 %314 }
 0x137   : > { %v316_v48 = vrot.slane %v315_v47, 4 }
 0x139   : > { %v317_v49 = vadd.f32 %v316_v48, %v315_v47 }
 0x13b   : > { %v318_v50 = vrot.slane %v317_v49, 2 }
 0x13d   : > { %v319_v51 = vadd.f32 %v318_v50, %v317_v49 }
 0x13f   : > { %v320_v52 = vrot.slane %v319_v51, 1 }
 0x141   : > { %v321_v53 = vadd.f32 %v320_v52, %v319_v51 }
 0x143   : > { %397 = vpush %v321_v53 }
 0x174   : > { %s398_s20 = spop %397 }
 0x175   : > { %v323_v54 = vstv %s398_s20 }
 0x176   : > { %v324_v55 = vmul.f32 1.3411045e-07, %v323_v54 }
 0x178   : > { %325 = vst [vmem:[%s174_s23] sm:$0x1] %v324_v55 }
 0x179 PF: > { %s12_s11 = sadd.s32 1, %s446_s11   ;;  %s511_s9 = smov %s442_s10 }
 0x17a   : > { %p9_p6 = scmp.ge.s32.totalorder %s12_s11, 4   ;;  %s512_s10 = smov %s514_s12 }
 0x17c   :  { %11 = sbr.rel (!%p9_p6) target bundleno = 2 (0x2), region = 66 }

// kernel: _lambda_.8
= control target key start
LH: loop header
LB: loop body
LE: loop exit
PB: predicated region body
PF: predicated region fallthrough
CT: control target
= control target key end

     0   :  { %vm35_vm0 = vcmask 130048   ;;  %v90_v6 = vmov 0.0   ;;  %s131_s0 = inlined_call_operand.vmem [shape: f32[5,16,256], index: 0, kind: input, shape index: {}]   ;;  %s132_s1 = inlined_call_operand.vmem [shape: f32[1,16,16], index: 1, kind: output, shape index: {}]  }
   0x1   :  { %v38_v0 = vld [vmem:[%s131_s0] sm:$0xff]  ;;  %v40_v1 = vld [vmem:[%s131_s0 + $0x10] sm:$0xff]  ;;  %v39_v2 = vld [vmem:[%s131_s0 + $0x8] sm:$0xff]  ;;  %36 = vst.msk [vmem:[%s132_s1] sm:$0xff] %vm35_vm0, %v90_v6 }
   0x2   :  { %v42_v3 = vpack.c.bf16 %v40_v1, %v38_v0  ;;  %v41_v4 = vld [vmem:[%s131_s0 + $0x18] sm:$0xff]  ;;  %37 = vst.msk [vmem:[%s132_s1 + $0x8] sm:$0xff] %vm35_vm0, %v90_v6 }
   0x3   :  { %v43_v5 = vpack.c.bf16 %v41_v4, %v39_v2 }
   0x4   :  { %53 = vmatpush.bf16.xpose.msra.mxu0 %v42_v3 }
   0x5   :  { %67 = vmatpush.bf16.xpose.msra.mxu1 %v43_v5 }
   0x8   :  { %v44_v8 = vld [vmem:[%s132_s1] sm:$0xff] }
   0x9   :  { %v45_v13 = vld [vmem:[%s132_s1 + $0x8] sm:$0xff] }
   0xb   :  { %54 = vmatmul.bf16.vlgmr.msra.gmra.mxu0 %v42_v3 }
   0xc   :  { %68 = vmatmul.bf16.vlgmr.msra.gmra.mxu1 %v43_v5 }
  0x88   :  { %v55_v7 = vpop.f32.mrf.mxu0 }
  0x89   :  { %v69_v9 = vpop.f32.mrf.mxu1 }
  0x8a   :  { %v70_v10 = vadd.f32 %v69_v9, %v55_v7 }
  0x8c   :  { %v74_v11 = vadd.f32 %v70_v10, %v44_v8 }
  0x8e   :  { %77 = vst.msk [vmem:[%s132_s1] sm:$0xff] %vm35_vm0, %v74_v11 }
  0x90   :  { %v57_v12 = vpop.f32.mrf.mxu0 }
  0x91   :  { %v71_v14 = vpop.f32.mrf.mxu1 }
  0x92   :  { %v72_v15 = vadd.f32 %v71_v14, %v57_v12 }
  0x94   :  { %v75_v16 = vadd.f32 %v72_v15, %v45_v13 }
  0x96   :  { %78 = vst.msk [vmem:[%s132_s1 + $0x8] sm:$0xff] %vm35_vm0, %v75_v16 }

// kernel: _lambda_.9
= control target key start
LH: loop header
LB: loop body
LE: loop exit
PB: predicated region body
PF: predicated region fallthrough
CT: control target
= control target key end

     0   :  { %s388_s9 = smov 0   ;;  %s390_s10 = smov 0   ;;  %s438_s0 = inlined_call_operand.vmem [shape: f32[16,16], index: 0, kind: input, shape index: {}]   ;;  %s439_s1 = inlined_call_operand.vmem [shape: f32[5,16,256], index: 1, kind: input, shape index: {}]   ;;  %s440_s2 = inlined_call_operand.vmem [shape: f32[2,1,128], index: 2, kind: output, shape index: {}]  }
   0x1   :  { %s392_s11 = smov 0  }
   0x2 LB: > { %s24_s12 = sadd.s32 1, %s366_s10  ;;  %p315_p0 = scmp.ge.s32.totalorder %s370_s11, 1  ;;  %s370_s11 = sphi %s392_s11, %s12_s11   ;;  %s366_s10 = sphi %s390_s10, %s442_s10   ;;  %s362_s9 = sphi %s388_s9, %s441_s9  }
   0x3   : > { %p26_p1 = scmp.ge.s32.totalorder %s24_s12, 2  ;;  %p135_p2 = scmp.lt.s32.totalorder %s370_s11, 3 }
   0x5   : > { %s444_s12 = smov (%p26_p1, %s24_s12), 0  ;;  %p136_p3 = pnand %p315_p0, %p135_p2 }
   0x6   : > { %s160_s13 = sadd.s32 (!%p136_p3), 1, %s362_s9  ;;  %p172_p5 = scmp.lt.s32.totalorder (!%p136_p3), %s362_s9, 1 }
   0x7   : > { %139 = sbr.rel (%p136_p3) target bundleno = 361 (0x169), region = 28  ;;  %p162_p4 = scmp.lt.s32.totalorder (!%p136_p3), %s160_s13, 4 }
   0xc   : > { %s446_s13 = smov (!%p162_p4, %s160_s13), 4  ;;  %vm180_vm0 = vcmask 130048   ;;  %v372_v6 = vmov 0.0   ;;  %v227_v17 = vld [vmem:[%s438_s0] sm:$0xff]  ;;  %v228_v20 = vld [vmem:[%s438_s0 + $0x8] sm:$0xff]  ;;  %s448_s9 = smov (!%p172_p5, %s362_s9), 1 }
   0xd   : > { %s320_s14 = sshll.u32 %s446_s13, 5  ;;  %181 = vst.msk [vmem:[#allocation2] sm:$0xff] %vm180_vm0, %v372_v6  ;;  %s174_s25 = scalar_lea.vmem %s440_s2, %s448_s9 }
   0xe   : > { %s169_s17 = scalar_lea.vmem %s439_s1, %s320_s14  ;;  %182 = vst.msk [vmem:[#allocation2 + $0x8] sm:$0xff] %vm180_vm0, %v372_v6 }
   0xf   : > { %v183_v0 = vld [vmem:[%s169_s17] sm:$0xff]  ;;  %v185_v1 = vld [vmem:[%s169_s17 + $0x10] sm:$0xff]  ;;  %v184_v2 = vld [vmem:[%s169_s17 + $0x8] sm:$0xff] }
  0x10   : > { %v187_v3 = vpack.c.bf16 %v185_v1, %v183_v0  ;;  %v186_v4 = vld [vmem:[%s169_s17 + $0x18] sm:$0xff] }
  0x11   : > { %v188_v5 = vpack.c.bf16 %v186_v4, %v184_v2 }
  0x12   : > { %198 = vmatpush.bf16.xpose.msra.mxu0 %v187_v3 }
  0x13   : > { %212 = vmatpush.bf16.xpose.msra.mxu1 %v188_v5 }
  0x14   : > { %v189_v8 = vld [vmem:[#allocation2] sm:$0xff] }
  0x15   : > { %v190_v13 = vld [vmem:[#allocation2 + $0x8] sm:$0xff] }
  0x19   : > { %199 = vmatmul.bf16.vlgmr.msra.gmra.mxu0 %v187_v3 }
  0x1a   : > { %213 = vmatmul.bf16.vlgmr.msra.gmra.mxu1 %v188_v5 }
  0x96   : > { %v200_v7 = vpop.f32.mrf.mxu0 }
  0x97   : > { %v214_v9 = vpop.f32.mrf.mxu1 }
  0x98   : > { %v215_v10 = vadd.f32 %v214_v9, %v200_v7 }
  0x9a   : > { %v219_v11 = vadd.f32 %v215_v10, %v189_v8 }
  0x9c   : > { %222 = vst.msk [vmem:[#allocation2] sm:$0xff] %vm180_vm0, %v219_v11 }
  0x9e   : > { %v202_v12 = vpop.f32.mrf.mxu0 }
  0x9f   : > { %v216_v14 = vpop.f32.mrf.mxu1 }
  0xa0   : > { %v217_v15 = vadd.f32 %v216_v14, %v202_v12 }
  0xa2   : > { %v220_v16 = vadd.f32 %v217_v15, %v190_v13 }
  0xa3   : > { %v229_v18 = vld [vmem:[#allocation2] sm:$0xff] }
  0xa4   : > { %223 = vst.msk [vmem:[#allocation2 + $0x8] sm:$0xff] %vm180_vm0, %v220_v16  ;;  %v231_v19 = vsub.f32 %v227_v17, %v229_v18 }
  0xa6   : > { %v233_v23 = vmul.f32 %v231_v19, %v231_v19 }
  0xa8   : > { %v235_v25 = vsel %vm180_vm0, %v233_v23, 0.0 }
  0xab   : > { %v230_v21 = vld [vmem:[#allocation2 + $0x8] sm:$0xff] }
  0xac   : > { %v232_v22 = vsub.f32 %v228_v20, %v230_v21 }
  0xae   : > { %v234_v24 = vmul.f32 %v232_v22, %v232_v22 }
  0xb0   : > { %v236_v26 = vsel %vm180_vm0, %v234_v24, 0.0 }
  0xb1   : > { %v237_v27 = vadd.f32 %v236_v26, %v235_v25 }
  0xb3   : > { %238 = vadd.xlane.f32.xlu0 %v237_v27 }
 0x126   : > { %v239_v28 = vpop.xlane.xlu0 %238 }
 0x127   : > { %v240_v29 = vrot.slane %v239_v28, 4 }
 0x129   : > { %v241_v30 = vadd.f32 %v240_v29, %v239_v28 }
 0x12b   : > { %v242_v31 = vrot.slane %v241_v30, 2 }
 0x12d   : > { %v243_v32 = vadd.f32 %v242_v31, %v241_v30 }
 0x12f   : > { %v244_v33 = vrot.slane %v243_v32, 1 }
 0x131   : > { %v245_v34 = vadd.f32 %v244_v33, %v243_v32 }
 0x133   : > { %321 = vpush %v245_v34 }
 0x164   : > { %s322_s22 = spop %321 }
 0x165   : > { %v247_v35 = vstv %s322_s22 }
 0x166   : > { %v248_v36 = vmul.f32 5.364418e-07, %v247_v35 }
 0x168   : > { %249 = vst [vmem:[%s174_s25] sm:$0x1] %v248_v36 }
 0x169 PF: > { %s12_s11 = sadd.s32 1, %s370_s11   ;;  %s441_s9 = smov %s366_s10 }
 0x16a   : > { %p9_p6 = scmp.ge.s32.totalorder %s12_s11, 4   ;;  %s442_s10 = smov %s444_s12 }
 0x16c   :  { %11 = sbr.rel (!%p9_p6) target bundleno = 2 (0x2), region = 66 }

// kernel: _lambda_.10
= control target key start
LH: loop header
LB: loop body
LE: loop exit
PB: predicated region body
PF: predicated region fallthrough
CT: control target
= control target key end

     0   :  { %vm30_vm0 = vcmask 261120   ;;  %vm45_vm1 = vcmask 523264   ;;  %v95_v2 = vmov 0.0   ;;  %s166_s0 = inlined_call_operand.vmem [shape: f32[5,32,64], index: 0, kind: input, shape index: {}]   ;;  %s167_s1 = inlined_call_operand.vmem [shape: f32[1,32,32], index: 1, kind: output, shape index: {}]  }
   0x1   :  { %v37_v0 = vld [vmem:[%s166_s0 + $0x10] sm:$0xff]  ;;  %v38_v1 = vld [vmem:[%s166_s0 + $0x18] sm:$0xff]  ;;  %31 = vst.msk [vmem:[%s167_s1] sm:$0xff] %vm30_vm0, %v95_v2  ;;  %v35_v4 = vld [vmem:[%s166_s0] sm:$0xff] }
   0x2   :  { %v40_v3 = vpack.c.bf16 %v38_v1, %v37_v0  ;;  %32 = vst.msk [vmem:[%s167_s1 + $0x8] sm:$0xff] %vm30_vm0, %v95_v2  ;;  %v36_v5 = vld [vmem:[%s166_s0 + $0x8] sm:$0xff] }
   0x3   :  { %33 = vst.msk [vmem:[%s167_s1 + $0x10] sm:$0xff] %vm30_vm0, %v95_v2  ;;  %v39_v7 = vpack.c.bf16 %v36_v5, %v35_v4 }
   0x4   :  { %v50_v6 = vsel %vm45_vm1, %v40_v3, 0  ;;  %34 = vst.msk [vmem:[%s167_s1 + $0x18] sm:$0xff] %vm30_vm0, %v95_v2 }
   0x5   :  { %58 = vmatpush.bf16.xpose.msra.mxu0 %v50_v6  ;;  %92 = vmatpush.bf16.xpose.msra.mxu1 %v50_v6  ;;  %v47_v8 = vsel %vm45_vm1, %v39_v7, 0 }
   0x8   :  { %v41_v9 = vld [vmem:[%s167_s1] sm:$0xff] }
   0x9   :  { %v42_v15 = vld [vmem:[%s167_s1 + $0x8] sm:$0xff] }
   0xa   :  { %v43_v10 = vld [vmem:[%s167_s1 + $0x10] sm:$0xff] }
   0xb   :  { %v44_v16 = vld [vmem:[%s167_s1 + $0x18] sm:$0xff] }
   0xd   :  { %59 = vmatpush.bf16.xpose.msra.mxu0 %v47_v8  ;;  %93 = vmatpush.bf16.xpose.msra.mxu1 %v47_v8 }
  0x14   :  { %90 = vmatmul.msk.bf16.vlgmr.msra.gmra.mxu0 %vm45_vm1, %v39_v7  ;;  %91 = vmatmul.msk.bf16.vlgmr.msra.gmra.mxu1 %vm45_vm1, %v40_v3 }
  0x91   :  { %v61_v11 = vpop.f32.mrf.mxu0  ;;  %v66_v12 = vpop.f32.mrf.mxu1 }
  0x92   :  { %v71_v13 = vadd.f32 %v61_v11, %v41_v9  ;;  %v73_v14 = vadd.f32 %v66_v12, %v43_v10 }
  0x94   :  { %76 = vst.msk [vmem:[%s167_s1] sm:$0xff] %vm30_vm0, %v71_v13 }
  0x95   :  { %78 = vst.msk [vmem:[%s167_s1 + $0x10] sm:$0xff] %vm30_vm0, %v73_v14 }
  0x99   :  { %v63_v17 = vpop.f32.mrf.mxu0  ;;  %v68_v18 = vpop.f32.mrf.mxu1 }
  0x9a   :  { %v72_v19 = vadd.f32 %v63_v17, %v42_v15  ;;  %v74_v20 = vadd.f32 %v68_v18, %v44_v16 }
  0x9c   :  { %77 = vst.msk [vmem:[%s167_s1 + $0x8] sm:$0xff] %vm30_vm0, %v72_v19 }
  0x9d   :  { %79 = vst.msk [vmem:[%s167_s1 + $0x18] sm:$0xff] %vm30_vm0, %v74_v20 }

// kernel: _lambda_.11
= control target key start
LH: loop header
LB: loop body
LE: loop exit
PB: predicated region body
PF: predicated region fallthrough
CT: control target
= control target key end

     0   :  { %s532_s12 = smov 0   ;;  %s534_s13 = smov 0   ;;  %s605_s0 = inlined_call_operand.vmem [shape: f32[32,32], index: 0, kind: input, shape index: {}]   ;;  %s606_s1 = inlined_call_operand.vmem [shape: f32[5,32,64], index: 1, kind: input, shape index: {}, may-alias: {1,2}]   ;;  %s607_s2 = inlined_call_operand.vmem [shape: f32[5,32,64], index: 2, kind: input, shape index: {}, may-alias: {1,2}]   ;;  %s608_s3 = inlined_call_operand.vmem [shape: f32[2,1,128], index: 3, kind: output, shape index: {}]  }
   0x1   :  { %s536_s14 = smov 0  }
   0x2 LB: > { %s25_s15 = sadd.s32 1, %s505_s13  ;;  %p445_p0 = scmp.ge.s32.totalorder %s509_s14, 1  ;;  %s509_s14 = sphi %s536_s14, %s13_s14   ;;  %s505_s13 = sphi %s534_s13, %s610_s13   ;;  %s501_s12 = sphi %s532_s12, %s609_s12  }
   0x3   : > { %p27_p1 = scmp.ge.s32.totalorder %s25_s15, 2  ;;  %p177_p2 = scmp.lt.s32.totalorder %s509_s14, 3 }
   0x5   : > { %s612_s15 = smov (%p27_p1, %s25_s15), 0  ;;  %p178_p3 = pnand %p445_p0, %p177_p2 }
   0x6   : > { %s212_s16 = sadd.s32 (!%p178_p3), 1, %s501_s12  ;;  %s222_s17 = sadd.s32 (!%p178_p3), 3, %s501_s12 }
   0x7   : > { %181 = sbr.rel (%p178_p3) target bundleno = 381 (0x17d), region = 32  ;;  %p213_p4 = scmp.lt.s32.totalorder (!%p178_p3), %s212_s16, 4 }
   0x8   : > { %p223_p5 = scmp.lt.s32.totalorder (!%p178_p3), %s222_s17, 4  ;;  %p232_p6 = scmp.lt.s32.totalorder (!%p178_p3), %s501_s12, 1 }
   0xc   : > { %vm245_vm0 = vcmask 523264   ;;  %vm240_vm1 = vcmask 261120   ;;  %v511_v0 = vmov 0.0   ;;  %s614_s16 = smov (!%p213_p4, %s212_s16), 4  ;;  %s616_s17 = smov (!%p223_p5, %s222_s17), 4  ;;  %v313_v38 = vld [vmem:[%s605_s0] sm:$0xff] }
   0xd   : > { %246 = vst.msk [vmem:[#allocation3] sm:$0xff] %vm245_vm0, %v511_v0  ;;  %s454_s18 = sshll.u32 %s614_s16, 5  ;;  %s455_s22 = sshll.u32 %s616_s17, 5  ;;  %v315_v40 = vld [vmem:[%s605_s0 + $0x10] sm:$0xff]  ;;  %v314_v43 = vld [vmem:[%s605_s0 + $0x8] sm:$0xff]  ;;  %v316_v44 = vld [vmem:[%s605_s0 + $0x18] sm:$0xff] }
   0xe   : > { %241 = vst.msk [vmem:[#allocation2] sm:$0xff] %vm240_vm1, %v511_v0  ;;  %s220_s21 = scalar_lea.vmem %s606_s1, %s454_s18  ;;  %s230_s25 = scalar_lea.vmem %s607_s2, %s455_s22 }
   0xf   : > { %242 = vst.msk [vmem:[#allocation2 + $0x8] sm:$0xff] %vm240_vm1, %v511_v0  ;;  %v249_v1 = vld [vmem:[%s220_s21 + $0x10] sm:$0xff]  ;;  %v250_v2 = vld [vmem:[%s220_s21 + $0x18] sm:$0xff]  ;;  %v247_v6 = vld [vmem:[%s220_s21] sm:$0xff]  ;;  %s618_s12 = smov (!%p232_p6, %s501_s12), 1 }
  0x10   : > { %243 = vst.msk [vmem:[#allocation2 + $0x10] sm:$0xff] %vm240_vm1, %v511_v0  ;;  %v252_v3 = vpack.c.bf16 %v250_v2, %v249_v1  ;;  %v294_v4 = vld [vmem:[%s230_s25 + $0x10] sm:$0xff]  ;;  %v295_v5 = vld [vmem:[%s230_s25 + $0x18] sm:$0xff]  ;;  %v248_v8 = vld [vmem:[%s220_s21 + $0x8] sm:$0xff]  ;;  %s234_s11 = scalar_lea.vmem %s608_s3, %s618_s12 }
  0x11   : > { %244 = vst.msk [vmem:[#allocation2 + $0x18] sm:$0xff] %vm240_vm1, %v511_v0  ;;  %v298_v7 = vsub.f32 %v249_v1, %v294_v4  ;;  %v292_v9 = vld [vmem:[%s230_s25] sm:$0xff]  ;;  %v293_v10 = vld [vmem:[%s230_s25 + $0x8] sm:$0xff]  ;;  %v299_v12 = vsub.f32 %v250_v2, %v295_v5  ;;  %v251_v16 = vpack.c.bf16 %v248_v8, %v247_v6 }
  0x12   : > { %v262_v11 = vsel %vm245_vm0, %v252_v3, 0  ;;  %v296_v13 = vsub.f32 %v247_v6, %v292_v9  ;;  %v297_v14 = vsub.f32 %v248_v8, %v293_v10 }
  0x13   : > { %270 = vmatpush.bf16.xpose.msra.mxu0 %v262_v11  ;;  %456 = vmatpush.bf16.xpose.msra.mxu1 %v262_v11  ;;  %v302_v15 = vmul.f32 %v298_v7, %v298_v7  ;;  %v303_v19 = vmul.f32 %v299_v12, %v299_v12  ;;  %v259_v21 = vsel %vm245_vm0, %v251_v16, 0 }
  0x14   : > { %v300_v17 = vmul.f32 %v296_v13, %v296_v13  ;;  %v301_v18 = vmul.f32 %v297_v14, %v297_v14  ;;  %v307_v23 = vld [vmem:[#allocation3] sm:$0xff] }
  0x15   : > { %v253_v26 = vld [vmem:[#allocation2] sm:$0xff] }
  0x16   : > { %v304_v20 = vadd.f32 %v301_v18, %v300_v17  ;;  %v254_v32 = vld [vmem:[#allocation2 + $0x8] sm:$0xff] }
  0x17   : > { %v255_v27 = vld [vmem:[#allocation2 + $0x10] sm:$0xff] }
  0x18   : > { %v305_v22 = vadd.f32 %v304_v20, %v302_v15  ;;  %v256_v33 = vld [vmem:[#allocation2 + $0x18] sm:$0xff] }
  0x1a   : > { %v306_v24 = vadd.f32 %v305_v22, %v303_v19 }
  0x1b   : > { %271 = vmatpush.bf16.xpose.msra.mxu0 %v259_v21  ;;  %457 = vmatpush.bf16.xpose.msra.mxu1 %v259_v21 }
  0x1c   : > { %v308_v25 = vadd.f32 %v307_v23, %v306_v24 }
  0x1e   : > { %309 = vst.msk [vmem:[#allocation3] sm:$0xff] %vm245_vm0, %v308_v25 }
  0x22   : > { %450 = vmatmul.msk.bf16.vlgmr.msra.gmra.mxu0 %vm245_vm0, %v251_v16  ;;  %451 = vmatmul.msk.bf16.vlgmr.msra.gmra.mxu1 %vm245_vm0, %v252_v3 }
  0x25   : > { %v347_v61 = vld [vmem:[#allocation3] sm:$0xff] }
  0x26   : > { %v348_v62 = vsel %vm245_vm0, %v347_v61, 0.0 }
  0x9f   : > { %v273_v28 = vpop.f32.mrf.mxu0  ;;  %v278_v29 = vpop.f32.mrf.mxu1 }
  0xa0   : > { %v283_v30 = vadd.f32 %v273_v28, %v253_v26  ;;  %v285_v31 = vadd.f32 %v278_v29, %v255_v27 }
  0xa2   : > { %288 = vst.msk [vmem:[#allocation2] sm:$0xff] %vm240_vm1, %v283_v30 }
  0xa3   : > { %290 = vst.msk [vmem:[#allocation2 + $0x10] sm:$0xff] %vm240_vm1, %v285_v31 }
  0xa7   : > { %v275_v34 = vpop.f32.mrf.mxu0  ;;  %v280_v35 = vpop.f32.mrf.mxu1 }
  0xa8   : > { %v284_v36 = vadd.f32 %v275_v34, %v254_v32  ;;  %v286_v37 = vadd.f32 %v280_v35, %v256_v33 }
  0xa9   : > { %v317_v39 = vld [vmem:[#allocation2] sm:$0xff] }
  0xaa   : > { %289 = vst.msk [vmem:[#allocation2 + $0x8] sm:$0xff] %vm240_vm1, %v284_v36  ;;  %v319_v41 = vld [vmem:[#allocation2 + $0x10] sm:$0xff]  ;;  %v321_v42 = vsub.f32 %v313_v38, %v317_v39 }
  0xab   : > { %291 = vst.msk [vmem:[#allocation2 + $0x18] sm:$0xff] %vm240_vm1, %v286_v37  ;;  %v323_v45 = vsub.f32 %v315_v40, %v319_v41 }
  0xac   : > { %v325_v49 = vmul.f32 %v321_v42, %v321_v42 }
  0xad   : > { %v327_v52 = vmul.f32 %v323_v45, %v323_v45 }
  0xae   : > { %v329_v54 = vsel %vm240_vm1, %v325_v49, 0.0 }
  0xaf   : > { %v332_v57 = vsel %vm240_vm1, %v327_v52, 0.0 }
  0xb1   : > { %v318_v46 = vld [vmem:[#allocation2 + $0x8] sm:$0xff] }
  0xb2   : > { %v320_v47 = vld [vmem:[#allocation2 + $0x18] sm:$0xff]  ;;  %v322_v48 = vsub.f32 %v314_v43, %v318_v46 }
  0xb3   : > { %v324_v50 = vsub.f32 %v316_v44, %v320_v47 }
  0xb4   : > { %v326_v51 = vmul.f32 %v322_v48, %v322_v48 }
  0xb5   : > { %v328_v53 = vmul.f32 %v324_v50, %v324_v50 }
  0xb6   : > { %v330_v55 = vsel %vm240_vm1, %v326_v51, 0.0 }
  0xb7   : > { %v331_v56 = vadd.f32 %v330_v55, %v329_v54  ;;  %v334_v59 = vsel %vm240_vm1, %v328_v53, 0.0 }
  0xb9   : > { %v333_v58 = vadd.f32 %v332_v57, %v331_v56 }
  0xbb   : > { %v335_v60 = vadd.f32 %v334_v59, %v333_v58 }
  0xbd   : > { %336 = vadd.xlane.f32.xlu0 %v335_v60 }
  0xc5   : > { %349 = vadd.xlane.f32.xlu0 %v348_v62 }
 0x130   : > { %v337_v63 = vpop.xlane.xlu0 %336 }
 0x131   : > { %v338_v0 = vrot.slane %v337_v63, 4 }
 0x133   : > { %v339_v1 = vadd.f32 %v338_v0, %v337_v63 }
 0x135   : > { %v340_v2 = vrot.slane %v339_v1, 2 }
 0x137   : > { %v341_v3 = vadd.f32 %v340_v2, %v339_v1 }
 0x138   : > { %v350_v4 = vpop.xlane.xlu0 %349 }
 0x139   : > { %v351_v5 = vrot.slane %v350_v4, 4  ;;  %v342_v6 = vrot.slane %v341_v3, 1 }
 0x13b   : > { %v352_v7 = vadd.f32 %v351_v5, %v350_v4  ;;  %v343_v8 = vadd.f32 %v342_v6, %v341_v3 }
 0x13d   : > { %v353_v9 = vrot.slane %v352_v7, 2  ;;  %458 = vpush %v343_v8 }
 0x13f   : > { %v354_v10 = vadd.f32 %v353_v9, %v352_v7 }
 0x141   : > { %v355_v11 = vrot.slane %v354_v10, 1 }
 0x143   : > { %v356_v12 = vadd.f32 %v355_v11, %v354_v10 }
 0x145   : > { %460 = vpush %v356_v12 }
 0x16e   : > { %s459_s7 = spop %458 }
 0x16f   : > { %v345_v13 = vstv %s459_s7 }
 0x170   : > { %v346_v15 = vmul.f32 2.1457672e-06, %v345_v13 }
 0x176   : > { %s461_s8 = spop %460 }
 0x177   : > { %v358_v14 = vstv %s461_s8 }
 0x178   : > { %v359_v16 = vmul.f32 0.00048828125, %v358_v14 }
 0x17a   : > { %v360_v17 = vadd.f32 %v359_v16, %v346_v15 }
 0x17c   : > { %361 = vst [vmem:[%s234_s11] sm:$0x1] %v360_v17 }
 0x17d PF: > { %s13_s14 = sadd.s32 1, %s509_s14   ;;  %s609_s12 = smov %s505_s13 }
 0x17e   : > { %p10_p7 = scmp.ge.s32.totalorder %s13_s14, 4   ;;  %s610_s13 = smov %s612_s15 }
 0x180   :  { %12 = sbr.rel (!%p10_p7) target bundleno = 2 (0x2), region = 73 }

</bundles_post_ra>
